<compile_context>
chip_gen: v5e
topology: v5e:2x2
jax: 0.10.0
libtpu: 0.0.40
codegen_flags: <defaults>
</compile_context>

<pallas_src>
import math
import numpy as np
import jax
import jax.numpy as jnp
from jax.experimental import pallas as pl
from jax.experimental.pallas import tpu as pltpu

# ----------------------------- config -----------------------------
B = 2            # batch
S = 8            # sequence length
D = 32           # embed_dim
H = 4            # num_heads
HD = D // H      # head dim
FF = 4 * D       # feed-forward hidden dim
BS = B * S       # flattened token count
HBS = H * BS     # head-major stacked row count (heads on sublanes)
LN_EPS = 1e-5
NEG_BIG = -1e9   # additive mask value for cross-(batch,head) attention
LANES = 128

# MXU operand dtype for BOTH sides of every matmul (f32 accumulation kept via
# preferred_element_type). bf16 is native on v5e/v6e/v7x MXUs and halves weight DMA bytes.
MM_DTYPE = jnp.bfloat16


# ----------------------------- kernel -----------------------------
def encoder_kernel(x_ref, w_ref, c_ref, out_ref):
    # x_ref : (BS, D) f32        flattened tokens
    # w_ref : (4D, 128) bf16     [wqkv | wo | w1 | w2^T] row blocks
    # c_ref : (8+HBS, 128) f32   rows 0-7: ln1_g, ln1_b, ln2_g, ln2_b, bqkv, bo, b1, b2
    #                            rows 8:8+HBS, lanes 0:HBS: attention mask
    x = x_ref[...]                                        # (BS, D) f32

    def layernorm(v, g, b):                               # all f32 (v5e-safe)
        mu = jnp.mean(v, axis=-1, keepdims=True)
        d = v - mu
        var = jnp.mean(d * d, axis=-1, keepdims=True)
        return d * jax.lax.rsqrt(var + LN_EPS) * g + b

    # ---- LayerNorm 1 ----
    a_in = layernorm(x, c_ref[0:1, 0:D], c_ref[1:2, 0:D])                     # (BS, D)

    # ---- fused QKV projection (one MXU push; 1/sqrt(HD) folded into the Q columns) ----
    qkv = jnp.dot(a_in.astype(MM_DTYPE), w_ref[0:D, 0:3 * D],
                  preferred_element_type=jnp.float32) + c_ref[4:5, 0:3 * D]   # (BS, 3D) f32

    # ---- stack heads on the sublane axis (head-major: row = h*BS + t) so that attention
    #      for all (batch, head) pairs is 2 MXU pushes instead of 8 ----
    def stack_heads(off):                                 # (BS, 3D) lanes -> (HBS, HD)
        return jnp.concatenate(
            [qkv[:, off + h * HD: off + (h + 1) * HD] for h in range(H)], axis=0)

    q_s = stack_heads(0).astype(MM_DTYPE)                 # (HBS, HD) bf16
    k_s = stack_heads(D).astype(MM_DTYPE)
    v_s = stack_heads(2 * D).astype(MM_DTYPE)

    # compile-time block-diagonal (head, batch) mask shipped in the const slab
    mask = c_ref[8:8 + HBS, 0:HBS]                        # (HBS, HBS) f32

    # one NT score matmul + one PV matmul on the MXU; softmax in f32
    s = jax.lax.dot_general(q_s, k_s, (((1,), (1,)), ((), ())),
                            preferred_element_type=jnp.float32) + mask        # (HBS, HBS)
    s = s - jnp.max(s, axis=-1, keepdims=True)
    p = jnp.exp(s)
    inv = pl.reciprocal(jnp.sum(p, axis=-1, keepdims=True), approx=True)      # EUP slot
    pv = jnp.dot(p.astype(MM_DTYPE), v_s,
                 preferred_element_type=jnp.float32) * inv                    # (HBS, HD) f32

    # ---- un-stack heads in registers (lane concat, XLU) -> single full-width Wo matmul ----
    attn_cat = jnp.concatenate([pv[h * BS:(h + 1) * BS, :] for h in range(H)], axis=1)
    attn = jnp.dot(attn_cat.astype(MM_DTYPE), w_ref[D:2 * D, 0:D],
                   preferred_element_type=jnp.float32) + c_ref[5:6, 0:D]      # (BS, D)

    # dropout = identity (eval mode)

    # ---- residual 1 + LayerNorm 2 ----
    x1 = x + attn
    f_in = layernorm(x1, c_ref[2:3, 0:D], c_ref[3:4, 0:D])

    # ---- FeedForward: Linear(D,4D) -> ReLU -> (dropout=identity) -> Linear(4D,D) ----
    h1 = jnp.maximum(jnp.dot(f_in.astype(MM_DTYPE), w_ref[2 * D:3 * D, :],
                             preferred_element_type=jnp.float32) + c_ref[6:7, :], 0.0)
    ff = jax.lax.dot_general(h1.astype(MM_DTYPE), w_ref[3 * D:4 * D, :],   # h1 @ W2 == NT vs W2^T
                             (((1,), (1,)), ((), ())),
                             preferred_element_type=jnp.float32) + c_ref[7:8, 0:D]

    # ---- residual 2 : single slab store ----
    out_ref[...] = (x1 + ff).astype(out_ref.dtype)


# ----------------------------- wrapper -----------------------------
def encoder_forward(tokens, params):
    (ln1_g, ln1_b, wq, bq, wk, bk, wv, bv, wo, bo,
     ln2_g, ln2_b, w1, b1, w2, b2) = params

    scale = 1.0 / math.sqrt(HD)
    # Fuse Q/K/V into one (D, 3D) projection and fold 1/sqrt(HD) into Q (wrapper-side).
    wqkv = jnp.concatenate([wq * scale, wk, wv], axis=1)       # (D, 3D)
    bqkv = jnp.concatenate([bq * scale, bk, bv], axis=1)       # (1, 3D)

    def pad_lanes(m):
        return jnp.pad(m, ((0, 0), (0, LANES - m.shape[1])))

    # One contiguous bf16 weight slab (single DMA descriptor):
    #   rows 0:D   wqkv | rows D:2D  wo | rows 2D:3D  w1 | rows 3D:4D  w2^T
    w_slab = jnp.concatenate(
        [pad_lanes(wqkv), pad_lanes(wo), pad_lanes(w1), pad_lanes(w2.T)],
        axis=0).astype(MM_DTYPE)                               # (4D, 128) bf16

    # One contiguous f32 const slab: LN gamma/beta, all biases, attention mask.
    bias_rows = jnp.concatenate(
        [pad_lanes(v) for v in (ln1_g, ln1_b, ln2_g, ln2_b, bqkv, bo, b1, b2)],
        axis=0)                                                # (8, 128)
    # head-major stacked index i = h*BS + t ; same head & same batch  <=>  i//S == j//S
    idx = np.arange(HBS)
    mask_np = np.where((idx[:, None] // S) == (idx[None, :] // S),
                       0.0, NEG_BIG).astype(np.float32)
    mask_rows = jnp.asarray(np.pad(mask_np, ((0, 0), (0, LANES - HBS))))      # (HBS, 128)
    c_slab = jnp.concatenate([bias_rows, mask_rows], axis=0)                  # (8+HBS, 128)

    x_flat = tokens.reshape(BS, D)      # flattened batch: one kernel step

    grid_spec = pltpu.PrefetchScalarGridSpec(
        num_scalar_prefetch=0,
        # Whole problem in one grid step: per-step overhead dominates at these shapes.
        # (For megacore scaling on v7x with large B, reintroduce a batch grid axis with
        # dimension_semantics=("parallel",) instead of flattening.)
        grid=(1,),
        in_specs=[
            pl.BlockSpec((BS, D), lambda i: (0, 0)),            # flattened tokens (f32)
            pl.BlockSpec((4 * D, LANES), lambda i: (0, 0)),     # packed bf16 weight slab
            pl.BlockSpec((8 + HBS, LANES), lambda i: (0, 0)),   # packed f32 const slab + mask
        ],
        out_specs=pl.BlockSpec((BS, D), lambda i: (0, 0)),
    )

    out_flat = pl.pallas_call(
        encoder_kernel,
        out_shape=jax.ShapeDtypeStruct((BS, D), jnp.float32),
        grid_spec=grid_spec,
        compiler_params=pltpu.CompilerParams(
            dimension_semantics=("arbitrary",)),
    )(x_flat, w_slab, c_slab)

    return out_flat.reshape(B, S, D)


# ----------------------------- reference (plain JAX, f32) -----------------------------
def encoder_reference(tokens, params):
    (ln1_g, ln1_b, wq, bq, wk, bk, wv, bv, wo, bo,
     ln2_g, ln2_b, w1, b1, w2, b2) = params

    def layernorm(v, g, b):
        mu = jnp.mean(v, axis=-1, keepdims=True)
        var = jnp.mean((v - mu) ** 2, axis=-1, keepdims=True)
        return (v - mu) * jax.lax.rsqrt(var + LN_EPS) * g[0] + b[0]

    a_in = layernorm(tokens, ln1_g, ln1_b)
    q = a_in @ wq + bq[0]
    k = a_in @ wk + bk[0]
    v = a_in @ wv + bv[0]
    qh = q.reshape(B, S, H, HD).transpose(0, 2, 1, 3)
    kh = k.reshape(B, S, H, HD).transpose(0, 2, 1, 3)
    vh = v.reshape(B, S, H, HD).transpose(0, 2, 1, 3)
    s = jnp.einsum("bhqd,bhkd->bhqk", qh, kh) / math.sqrt(HD)
    p = jax.nn.softmax(s, axis=-1)
    o = jnp.einsum("bhqk,bhkd->bhqd", p, vh).transpose(0, 2, 1, 3).reshape(B, S, D)
    attn = o @ wo + bo[0]
    x1 = tokens + attn
    f_in = layernorm(x1, ln2_g, ln2_b)
    ff = jnp.maximum(f_in @ w1 + b1[0], 0.0) @ w2 + b2[0]
    return x1 + ff


# ----------------------------- main -----------------------------
if __name__ == "__main__":
    key = jax.random.PRNGKey(0)
    keys = jax.random.split(key, 8)

    tokens = jax.random.normal(keys[0], (B, S, D), dtype=jnp.float32)

    def winit(k, shape):
        return (0.02 * jax.random.normal(k, shape)).astype(jnp.float32)

    params = (
        jnp.ones((1, D), jnp.float32),   # ln1 gamma
        jnp.zeros((1, D), jnp.float32),  # ln1 beta
        winit(keys[1], (D, D)), jnp.zeros((1, D), jnp.float32),    # Wq, bq
        winit(keys[2], (D, D)), jnp.zeros((1, D), jnp.float32),    # Wk, bk
        winit(keys[3], (D, D)), jnp.zeros((1, D), jnp.float32),    # Wv, bv
        winit(keys[4], (D, D)), jnp.zeros((1, D), jnp.float32),    # Wo, bo
        jnp.ones((1, D), jnp.float32),   # ln2 gamma
        jnp.zeros((1, D), jnp.float32),  # ln2 beta
        winit(keys[5], (D, FF)), jnp.zeros((1, FF), jnp.float32),  # W1, b1
        winit(keys[6], (FF, D)), jnp.zeros((1, D), jnp.float32),   # W2, b2
    )

    out = encoder_forward(tokens, params)
    out = jax.block_until_ready(out)

    ref = encoder_reference(tokens, params)
    assert out.shape == (B, S, D)
    max_err = float(jnp.max(jnp.abs(out - ref)))
    # Tolerance sized for deliberate bf16 MXU operands (f32 accumulation) vs the f32 reference.
    assert jnp.allclose(out, ref, atol=2.5e-3, rtol=2.5e-3), \
        f"mismatch vs JAX reference (max abs err={max_err})"

    # TODO(synk): dropout is identity (eval mode); FeedForward activation assumed ReLU
    # since the original FeedForward module definition was not provided.
    print("KERNEL_OK")
</pallas_src>

<mosaic_0001>
module attributes {stable_mosaic.version = 11 : i64} {
  func.func @encoder_kernel(%arg0: i32, %arg1: memref<16x32xf32, #tpu.memory_space<vmem>>, %arg2: memref<128x128xbf16, #tpu.memory_space<vmem>>, %arg3: memref<72x128xf32, #tpu.memory_space<vmem>>, %arg4: memref<16x32xf32, #tpu.memory_space<vmem>>) attributes {dimension_semantics = [#tpu.dimension_semantics<arbitrary>], iteration_bounds = array<i64: 1>, scalar_prefetch = 0 : i64, scratch_operands = 0 : i64, tpu.core_type = #tpu.core_type<tc>, window_params = [{pipeline_mode = #tpu.pipeline_mode<synchronous>, transform_indices = @transform_0, window_bounds = array<i64: 16, 32>}, {pipeline_mode = #tpu.pipeline_mode<synchronous>, transform_indices = @transform_1, window_bounds = array<i64: 128, 128>}, {pipeline_mode = #tpu.pipeline_mode<synchronous>, transform_indices = @transform_2, window_bounds = array<i64: 72, 128>}, {pipeline_mode = #tpu.pipeline_mode<synchronous>, transform_indices = @transform_3, window_bounds = array<i64: 16, 32>}]} {
    %c0 = arith.constant 0 : index
    %c0_0 = arith.constant 0 : index
    %0 = vector.load %arg1[%c0, %c0_0] : memref<16x32xf32, #tpu.memory_space<vmem>>, vector<16x32xf32>
    %c0_1 = arith.constant 0 : index
    %c0_2 = arith.constant 0 : index
    %1 = vector.load %arg3[%c0_1, %c0_2] : memref<72x128xf32, #tpu.memory_space<vmem>>, vector<1x32xf32>
    %c1 = arith.constant 1 : index
    %c0_3 = arith.constant 0 : index
    %2 = vector.load %arg3[%c1, %c0_3] : memref<72x128xf32, #tpu.memory_space<vmem>>, vector<1x32xf32>
    %cst = arith.constant dense<0.000000e+00> : vector<16xf32>
    %3 = vector.multi_reduction <add>, %0, %cst [1] : vector<16x32xf32> to vector<16xf32>
    %4 = vector.shape_cast %3 : vector<16xf32> to vector<16x1xf32>
    %cst_4 = arith.constant 3.200000e+01 : f32
    %5 = vector.broadcast %cst_4 : f32 to vector<16x1xf32>
    %6 = arith.divf %4, %5 : vector<16x1xf32>
    %7 = vector.broadcast %6 : vector<16x1xf32> to vector<16x32xf32>
    %8 = arith.subf %0, %7 : vector<16x32xf32>
    %9 = arith.mulf %8, %8 : vector<16x32xf32>
    %cst_5 = arith.constant dense<0.000000e+00> : vector<16xf32>
    %10 = vector.multi_reduction <add>, %9, %cst_5 [1] : vector<16x32xf32> to vector<16xf32>
    %11 = vector.shape_cast %10 : vector<16xf32> to vector<16x1xf32>
    %cst_6 = arith.constant 3.200000e+01 : f32
    %12 = vector.broadcast %cst_6 : f32 to vector<16x1xf32>
    %13 = arith.divf %11, %12 : vector<16x1xf32>
    %cst_7 = arith.constant 9.99999974E-6 : f32
    %14 = vector.broadcast %cst_7 : f32 to vector<16x1xf32>
    %15 = arith.addf %13, %14 : vector<16x1xf32>
    %16 = math.rsqrt %15 : vector<16x1xf32>
    %17 = vector.broadcast %16 : vector<16x1xf32> to vector<16x32xf32>
    %18 = arith.mulf %8, %17 : vector<16x32xf32>
    %19 = vector.broadcast %1 : vector<1x32xf32> to vector<16x32xf32>
    %20 = arith.mulf %18, %19 : vector<16x32xf32>
    %21 = vector.broadcast %2 : vector<1x32xf32> to vector<16x32xf32>
    %22 = arith.addf %20, %21 : vector<16x32xf32>
    %23 = arith.truncf %22 : vector<16x32xf32> to vector<16x32xbf16>
    %c0_8 = arith.constant 0 : index
    %c0_9 = arith.constant 0 : index
    %24 = vector.load %arg2[%c0_8, %c0_9] : memref<128x128xbf16, #tpu.memory_space<vmem>>, vector<32x96xbf16>
    %cst_10 = arith.constant dense<0.000000e+00> : vector<16x96xf32>
    %25 = tpu.matmul %23, %24, %cst_10 {dimension_numbers = #tpu.dot_dimension_numbers<[1], [0], [0], [1], [0, 0, 1, 1], [], []>} : vector<16x32xbf16>, vector<32x96xbf16>, vector<16x96xf32> -> vector<16x96xf32>
    %c4 = arith.constant 4 : index
    %c0_11 = arith.constant 0 : index
    %26 = vector.load %arg3[%c4, %c0_11] : memref<72x128xf32, #tpu.memory_space<vmem>>, vector<1x96xf32>
    %27 = vector.broadcast %26 : vector<1x96xf32> to vector<16x96xf32>
    %28 = arith.addf %25, %27 : vector<16x96xf32>
    %29 = vector.extract_strided_slice %28 {offsets = [0, 0], sizes = [16, 8], strides = [1, 1]} : vector<16x96xf32> to vector<16x8xf32>
    %30 = vector.extract_strided_slice %28 {offsets = [0, 8], sizes = [16, 8], strides = [1, 1]} : vector<16x96xf32> to vector<16x8xf32>
    %31 = vector.extract_strided_slice %28 {offsets = [0, 16], sizes = [16, 8], strides = [1, 1]} : vector<16x96xf32> to vector<16x8xf32>
    %32 = vector.extract_strided_slice %28 {offsets = [0, 24], sizes = [16, 8], strides = [1, 1]} : vector<16x96xf32> to vector<16x8xf32>
    %33 = tpu.concatenate %29, %30, %31, %32 in 0 : vector<16x8xf32>, vector<16x8xf32>, vector<16x8xf32>, vector<16x8xf32> -> vector<64x8xf32>
    %34 = arith.truncf %33 : vector<64x8xf32> to vector<64x8xbf16>
    %35 = vector.extract_strided_slice %28 {offsets = [0, 32], sizes = [16, 8], strides = [1, 1]} : vector<16x96xf32> to vector<16x8xf32>
    %36 = vector.extract_strided_slice %28 {offsets = [0, 40], sizes = [16, 8], strides = [1, 1]} : vector<16x96xf32> to vector<16x8xf32>
    %37 = vector.extract_strided_slice %28 {offsets = [0, 48], sizes = [16, 8], strides = [1, 1]} : vector<16x96xf32> to vector<16x8xf32>
    %38 = vector.extract_strided_slice %28 {offsets = [0, 56], sizes = [16, 8], strides = [1, 1]} : vector<16x96xf32> to vector<16x8xf32>
    %39 = tpu.concatenate %35, %36, %37, %38 in 0 : vector<16x8xf32>, vector<16x8xf32>, vector<16x8xf32>, vector<16x8xf32> -> vector<64x8xf32>
    %40 = arith.truncf %39 : vector<64x8xf32> to vector<64x8xbf16>
    %41 = vector.extract_strided_slice %28 {offsets = [0, 64], sizes = [16, 8], strides = [1, 1]} : vector<16x96xf32> to vector<16x8xf32>
    %42 = vector.extract_strided_slice %28 {offsets = [0, 72], sizes = [16, 8], strides = [1, 1]} : vector<16x96xf32> to vector<16x8xf32>
    %43 = vector.extract_strided_slice %28 {offsets = [0, 80], sizes = [16, 8], strides = [1, 1]} : vector<16x96xf32> to vector<16x8xf32>
    %44 = vector.extract_strided_slice %28 {offsets = [0, 88], sizes = [16, 8], strides = [1, 1]} : vector<16x96xf32> to vector<16x8xf32>
    %45 = tpu.concatenate %41, %42, %43, %44 in 0 : vector<16x8xf32>, vector<16x8xf32>, vector<16x8xf32>, vector<16x8xf32> -> vector<64x8xf32>
    %46 = arith.truncf %45 : vector<64x8xf32> to vector<64x8xbf16>
    %c8 = arith.constant 8 : index
    %c0_12 = arith.constant 0 : index
    %47 = vector.load %arg3[%c8, %c0_12] : memref<72x128xf32, #tpu.memory_space<vmem>>, vector<64x64xf32>
    %cst_13 = arith.constant dense<0.000000e+00> : vector<64x64xf32>
    %48 = tpu.matmul %34, %40, %cst_13 {dimension_numbers = #tpu.dot_dimension_numbers<[1], [1], [0], [0], [0, 0, 1, 0], [], []>} : vector<64x8xbf16>, vector<64x8xbf16>, vector<64x64xf32> -> vector<64x64xf32>
    %49 = arith.addf %48, %47 : vector<64x64xf32>
    %cst_14 = arith.constant dense<0xFF800000> : vector<64xf32>
    %50 = vector.multi_reduction <maximumf>, %49, %cst_14 [1] : vector<64x64xf32> to vector<64xf32>
    %51 = vector.shape_cast %50 : vector<64xf32> to vector<64x1xf32>
    %52 = vector.broadcast %51 : vector<64x1xf32> to vector<64x64xf32>
    %53 = arith.subf %49, %52 : vector<64x64xf32>
    %54 = math.exp %53 : vector<64x64xf32>
    %cst_15 = arith.constant dense<0.000000e+00> : vector<64xf32>
    %55 = vector.multi_reduction <add>, %54, %cst_15 [1] : vector<64x64xf32> to vector<64xf32>
    %56 = vector.shape_cast %55 : vector<64xf32> to vector<64x1xf32>
    %57 = tpu.reciprocal %56 {approx = true} : vector<64x1xf32> -> vector<64x1xf32>
    %58 = arith.truncf %54 : vector<64x64xf32> to vector<64x64xbf16>
    %cst_16 = arith.constant dense<0.000000e+00> : vector<64x8xf32>
    %59 = tpu.matmul %58, %46, %cst_16 {dimension_numbers = #tpu.dot_dimension_numbers<[1], [0], [0], [1], [0, 0, 1, 1], [], []>} : vector<64x64xbf16>, vector<64x8xbf16>, vector<64x8xf32> -> vector<64x8xf32>
    %60 = vector.broadcast %57 : vector<64x1xf32> to vector<64x8xf32>
    %61 = arith.mulf %59, %60 : vector<64x8xf32>
    %62 = vector.extract_strided_slice %61 {offsets = [0, 0], sizes = [16, 8], strides = [1, 1]} : vector<64x8xf32> to vector<16x8xf32>
    %63 = vector.extract_strided_slice %61 {offsets = [16, 0], sizes = [16, 8], strides = [1, 1]} : vector<64x8xf32> to vector<16x8xf32>
    %64 = vector.extract_strided_slice %61 {offsets = [32, 0], sizes = [16, 8], strides = [1, 1]} : vector<64x8xf32> to vector<16x8xf32>
    %65 = vector.extract_strided_slice %61 {offsets = [48, 0], sizes = [16, 8], strides = [1, 1]} : vector<64x8xf32> to vector<16x8xf32>
    %66 = tpu.concatenate %62, %63, %64, %65 in 1 : vector<16x8xf32>, vector<16x8xf32>, vector<16x8xf32>, vector<16x8xf32> -> vector<16x32xf32>
    %67 = arith.truncf %66 : vector<16x32xf32> to vector<16x32xbf16>
    %c32 = arith.constant 32 : index
    %c0_17 = arith.constant 0 : index
    %68 = vector.load %arg2[%c32, %c0_17] : memref<128x128xbf16, #tpu.memory_space<vmem>>, vector<32x32xbf16>
    %cst_18 = arith.constant dense<0.000000e+00> : vector<16x32xf32>
    %69 = tpu.matmul %67, %68, %cst_18 {dimension_numbers = #tpu.dot_dimension_numbers<[1], [0], [0], [1], [0, 0, 1, 1], [], []>} : vector<16x32xbf16>, vector<32x32xbf16>, vector<16x32xf32> -> vector<16x32xf32>
    %c5 = arith.constant 5 : index
    %c0_19 = arith.constant 0 : index
    %70 = vector.load %arg3[%c5, %c0_19] : memref<72x128xf32, #tpu.memory_space<vmem>>, vector<1x32xf32>
    %71 = vector.broadcast %70 : vector<1x32xf32> to vector<16x32xf32>
    %72 = arith.addf %69, %71 : vector<16x32xf32>
    %73 = arith.addf %0, %72 : vector<16x32xf32>
    %c2 = arith.constant 2 : index
    %c0_20 = arith.constant 0 : index
    %74 = vector.load %arg3[%c2, %c0_20] : memref<72x128xf32, #tpu.memory_space<vmem>>, vector<1x32xf32>
    %c3 = arith.constant 3 : index
    %c0_21 = arith.constant 0 : index
    %75 = vector.load %arg3[%c3, %c0_21] : memref<72x128xf32, #tpu.memory_space<vmem>>, vector<1x32xf32>
    %cst_22 = arith.constant dense<0.000000e+00> : vector<16xf32>
    %76 = vector.multi_reduction <add>, %73, %cst_22 [1] : vector<16x32xf32> to vector<16xf32>
    %77 = vector.shape_cast %76 : vector<16xf32> to vector<16x1xf32>
    %cst_23 = arith.constant 3.200000e+01 : f32
    %78 = vector.broadcast %cst_23 : f32 to vector<16x1xf32>
    %79 = arith.divf %77, %78 : vector<16x1xf32>
    %80 = vector.broadcast %79 : vector<16x1xf32> to vector<16x32xf32>
    %81 = arith.subf %73, %80 : vector<16x32xf32>
    %82 = arith.mulf %81, %81 : vector<16x32xf32>
    %cst_24 = arith.constant dense<0.000000e+00> : vector<16xf32>
    %83 = vector.multi_reduction <add>, %82, %cst_24 [1] : vector<16x32xf32> to vector<16xf32>
    %84 = vector.shape_cast %83 : vector<16xf32> to vector<16x1xf32>
    %cst_25 = arith.constant 3.200000e+01 : f32
    %85 = vector.broadcast %cst_25 : f32 to vector<16x1xf32>
    %86 = arith.divf %84, %85 : vector<16x1xf32>
    %cst_26 = arith.constant 9.99999974E-6 : f32
    %87 = vector.broadcast %cst_26 : f32 to vector<16x1xf32>
    %88 = arith.addf %86, %87 : vector<16x1xf32>
    %89 = math.rsqrt %88 : vector<16x1xf32>
    %90 = vector.broadcast %89 : vector<16x1xf32> to vector<16x32xf32>
    %91 = arith.mulf %81, %90 : vector<16x32xf32>
    %92 = vector.broadcast %74 : vector<1x32xf32> to vector<16x32xf32>
    %93 = arith.mulf %91, %92 : vector<16x32xf32>
    %94 = vector.broadcast %75 : vector<1x32xf32> to vector<16x32xf32>
    %95 = arith.addf %93, %94 : vector<16x32xf32>
    %96 = arith.truncf %95 : vector<16x32xf32> to vector<16x32xbf16>
    %c64 = arith.constant 64 : index
    %c0_27 = arith.constant 0 : index
    %97 = vector.load %arg2[%c64, %c0_27] : memref<128x128xbf16, #tpu.memory_space<vmem>>, vector<32x128xbf16>
    %cst_28 = arith.constant dense<0.000000e+00> : vector<16x128xf32>
    %98 = tpu.matmul %96, %97, %cst_28 {dimension_numbers = #tpu.dot_dimension_numbers<[1], [0], [0], [1], [0, 0, 1, 1], [], []>} : vector<16x32xbf16>, vector<32x128xbf16>, vector<16x128xf32> -> vector<16x128xf32>
    %c6 = arith.constant 6 : index
    %c0_29 = arith.constant 0 : index
    %99 = vector.load %arg3[%c6, %c0_29] : memref<72x128xf32, #tpu.memory_space<vmem>>, vector<1x128xf32>
    %100 = vector.broadcast %99 : vector<1x128xf32> to vector<16x128xf32>
    %101 = arith.addf %98, %100 : vector<16x128xf32>
    %cst_30 = arith.constant 0.000000e+00 : f32
    %102 = vector.broadcast %cst_30 : f32 to vector<16x128xf32>
    %103 = arith.maximumf %101, %102 : vector<16x128xf32>
    %104 = arith.truncf %103 : vector<16x128xf32> to vector<16x128xbf16>
    %c96 = arith.constant 96 : index
    %c0_31 = arith.constant 0 : index
    %105 = vector.load %arg2[%c96, %c0_31] : memref<128x128xbf16, #tpu.memory_space<vmem>>, vector<32x128xbf16>
    %cst_32 = arith.constant dense<0.000000e+00> : vector<16x32xf32>
    %106 = tpu.matmul %104, %105, %cst_32 {dimension_numbers = #tpu.dot_dimension_numbers<[1], [1], [0], [0], [0, 0, 1, 0], [], []>} : vector<16x128xbf16>, vector<32x128xbf16>, vector<16x32xf32> -> vector<16x32xf32>
    %c7 = arith.constant 7 : index
    %c0_33 = arith.constant 0 : index
    %107 = vector.load %arg3[%c7, %c0_33] : memref<72x128xf32, #tpu.memory_space<vmem>>, vector<1x32xf32>
    %108 = vector.broadcast %107 : vector<1x32xf32> to vector<16x32xf32>
    %109 = arith.addf %106, %108 : vector<16x32xf32>
    %110 = arith.addf %73, %109 : vector<16x32xf32>
    %c0_34 = arith.constant 0 : index
    %c0_35 = arith.constant 0 : index
    %111 = vector.load %arg4[%c0_34, %c0_35] : memref<16x32xf32, #tpu.memory_space<vmem>>, vector<16x32xf32>
    tpu.vector_store %arg4[%c0_34, %c0_35], %110 {strides = array<i32>} : memref<16x32xf32, #tpu.memory_space<vmem>>, vector<16x32xf32>,
    return
  }
  func.func @transform_0(%arg0: i32) -> (i32, i32) {
    %c0_i32 = arith.constant 0 : i32
    %c0_i32_0 = arith.constant 0 : i32
    %c0_i32_1 = arith.constant 0 : i32
    return %c0_i32, %c0_i32_0 : i32, i32
  }
  func.func @transform_1(%arg0: i32) -> (i32, i32) {
    %c0_i32 = arith.constant 0 : i32
    %c0_i32_0 = arith.constant 0 : i32
    %c0_i32_1 = arith.constant 0 : i32
    return %c0_i32, %c0_i32_0 : i32, i32
  }
  func.func @transform_2(%arg0: i32) -> (i32, i32) {
    %c0_i32 = arith.constant 0 : i32
    %c0_i32_0 = arith.constant 0 : i32
    %c0_i32_1 = arith.constant 0 : i32
    return %c0_i32, %c0_i32_0 : i32, i32
  }
  func.func @transform_3(%arg0: i32) -> (i32, i32) {
    %c0_i32 = arith.constant 0 : i32
    %c0_i32_0 = arith.constant 0 : i32
    %c0_i32_1 = arith.constant 0 : i32
    return %c0_i32, %c0_i32_0 : i32, i32
  }
}

</mosaic_0001>

<bundles_post_ra>
// kernel: tpu_custom_call.1
= control target key start
LH: loop header
LB: loop body
LE: loop exit
PB: predicated region body
PF: predicated region fallthrough
CT: control target
= control target key end

     0   :  { %8 = vsyncpa [#allocation3], 0  ;;  %s1010_s0 = inlined_call_operand.hbm [shape: f32[16,32], index: 0, kind: input, shape index: {}]   ;;  %s1011_s1 = inlined_call_operand.hbm [shape: bf16[128,128], index: 1, kind: input, shape index: {}]   ;;  %s1012_s2 = inlined_call_operand.hbm [shape: f32[72,128], index: 2, kind: input, shape index: {}]   ;;  %s1013_s3 = inlined_call_operand.hbm [shape: f32[16,32], index: 3, kind: output, shape index: {}]  }
   0x1   :  { %9 = vsyncpa [#allocation6], 0  ;;  %s28_s14 = sshll.u32 %s1011_s1, 4  ;;  %s29_s14 = int_to_ptr.hbm [resolvable:$true] %s28_s14 }
   0x2   :  { %10 = vsyncpa [#allocation4], 0  ;;  %s874_s15 = smov [#allocation5]   ;;  %s15_s19 = sshll.u32 %s1010_s0, 4  ;;  %s16_s19 = int_to_ptr.hbm [resolvable:$true] %s15_s19 }
   0x3   :  { %s30_s16 = sshll.u32 %s874_s15, 4  ;;  %s875_s20 = smov 64   ;;  %s31_s16 = int_to_ptr.vmem [resolvable:$true] %s30_s16 }
   0x4   :  { %s876_s21 = smov 4   ;;  %s877_s22 = smov [#allocation2]  }
   0x5   :  { %36 = dma.hbm_to_vmem [thread:$0]  %s29_s14, 1024, %s31_s16, [#allocation6], %s875_s20, %s875_s20, %s876_s21  }
   0x6   :  { %s17_s23 = sshll.u32 %s877_s22, 4  ;;  %s878_s24 = smov 128   ;;  %s18_s23 = int_to_ptr.vmem [resolvable:$true] %s17_s23 }
   0x7   :  { %s879_s1 = smov 8   ;;  %s41_s27 = sshll.u32 %s1012_s2, 4  ;;  %s42_s27 = int_to_ptr.hbm [resolvable:$true] %s41_s27 }
   0x8   :  { %23 = dma.hbm_to_vmem [thread:$0]  %s16_s19, 256, %s18_s23, [#allocation3], %s878_s24, %s878_s24, %s879_s1  }
   0x9   :  { %s880_s0 = smov [#allocation7]  }
   0xa   :  { %s43_s28 = sshll.u32 %s880_s0, 4  ;;  %s44_s28 = int_to_ptr.vmem [resolvable:$true] %s43_s28 }
   0xb   :  { %49 = dma.hbm_to_vmem [thread:$0]  %s42_s27, 1152, %s44_s28, [#allocation6], %s878_s24, %s878_s24, %s879_s1  }
   0xc   :  { %868 = dma.done.wait [#allocation3], 256  }
   0xd   :  { %869 = vsyncadd [#allocation3], 4294967040 }
   0xe   :  { %870 = dma.done.wait [#allocation6], 2176  }
   0xf   :  { %871 = vsyncadd [#allocation6], 4294965120  ;;  %vm67_vm0 = vcmask 261120   ;;  %v926_v0 = vld [vmem:[#allocation2] sm:$0xff]  ;;  %v930_v2 = vld [vmem:[#allocation2 + $0x8] sm:$0xff]  ;;  %v881_v4 = vmov 32.0  }
  0x10   :  { %v68_v1 = vsel %vm67_vm0, %v926_v0, 0.0  ;;  %v71_v3 = vsel %vm67_vm0, %v930_v2, 0.0  ;;  %730 = vrcp.f32 %v881_v4  ;;  %v666_v21 = vld [vmem:[#allocation5 + $0x8] sm:$0xff]  ;;  %v665_v23 = vld [vmem:[#allocation5] sm:$0xff]  ;;  %s882_s2 = smov 120   ;;  %s883_s29 = smov 104  }
  0x11   :  { %69 = vadd.xlane.f32.xlu0 %v68_v1  ;;  %153 = vmatpush.bf16.msra.mxu0 %v666_v21  ;;  %v722_v42 = vld [vmem:[#allocation7] ss:$0 sm:$0xff]  ;;  %v723_v47 = vld [vmem:[#allocation7 + $0x1] ss:$0 sm:$0xff]  ;;  %v724_v53 = vld [vmem:[#allocation7 + $0x4] ss:$0 sm:$0xff] }
  0x12   :  { %s884_s30 = smov 112   ;;  %s885_s4 = smov 96   ;;  %vm205_vm8 = vcmask 64512   ;;  %vm259_vm9 = vcmask 523264   ;;  %vm431_vm10 = vcmask 130048   ;;  %vm434_vm11 = vcmask 195584  }
  0x13   :  { %s886_s5 = smov 16   ;;  %s887_s6 = smov 24  }
  0x14   :  { %s888_s7 = smov [#allocation8]   ;;  %s608_s11 = sshll.u32 %s1013_s3, 4  ;;  %s609_s11 = int_to_ptr.hbm [resolvable:$true] %s608_s11 }
  0x15   :  { %154 = vmatpush.bf16.msra.mxu0 %v665_v23  ;;  %v187_v23 = vld [vmem:[#allocation7 + $0x18] sm:$0xff]  ;;  %s606_s8 = sshll.u32 %s888_s7, 4  ;;  %s607_s8 = int_to_ptr.vmem [resolvable:$true] %s606_s8 }
  0x16   :  { %v731_v5 = vpop.eup %730 }
  0x17   :  { %v75_v6 = vmul.f32 32.0, %v731_v5  ;;  %vm79_vm1 = vweird.f32 %v731_v5 }
  0x19   :  { %72 = vadd.xlane.f32.xlu0 %v71_v3  ;;  %v76_v7 = vsub.f32 1.0, %v75_v6 }
  0x1b   :  { %v77_v8 = vmul.f32 %v731_v5, %v76_v7 }
  0x1d   :  { %v78_v9 = vadd.f32 %v731_v5, %v77_v8 }
  0x1f   :  { %v934_v10 = vsel %vm79_vm1, %v731_v5, %v78_v9 }
  0x84   :  { %v70_v11 = vpop.xlane.xlu0 %69 }
  0x85   :  { %v81_v12 = vmul.f32 %v934_v10, %v70_v11 }
  0x87   :  { %v83_v13 = vsub.f32 %v926_v0, %v81_v12 }
  0x89   :  { %v85_v14 = vmul.f32 %v83_v13, %v83_v13 }
  0x8b   :  { %v87_v15 = vsel %vm67_vm0, %v85_v14, 0.0 }
  0x8c   :  { %88 = vadd.xlane.f32.xlu1 %v87_v15  ;;  %v73_v16 = vpop.xlane.xlu0 %72 }
  0x8d   :  { %v82_v17 = vmul.f32 %v934_v10, %v73_v16 }
  0x8f   :  { %v84_v18 = vsub.f32 %v930_v2, %v82_v17 }
  0x91   :  { %v86_v19 = vmul.f32 %v84_v18, %v84_v18 }
  0x93   :  { %v90_v20 = vsel %vm67_vm0, %v86_v19, 0.0 }
  0x94   :  { %91 = vadd.xlane.f32.xlu1 %v90_v20 }
  0xff   :  { %v89_v22 = vpop.xlane.xlu1 %88 }
 0x100   :  { %v93_v24 = vmul.f32 %v89_v22, %v934_v10  ;;  %v185_v22 = vld [vmem:[#allocation7 + $0x8] sm:$0xff] }
 0x102   :  { %v95_v25 = vadd.f32 1e-05, %v93_v24 }
 0x104   :  { %732 = vrsqrt.f32 %v95_v25  ;;  %vm103_vm3 = vweird.f32 %v95_v25 }
 0x107   :  { %v92_v26 = vpop.xlane.xlu1 %91 }
 0x108   :  { %v94_v27 = vmul.f32 %v92_v26, %v934_v10 }
 0x10a   :  { %v733_v28 = vpop.eup %732  ;;  %v96_v29 = vadd.f32 1e-05, %v94_v27 }
 0x10b   :  { %v98_v30 = vmul.f32 %v733_v28, %v95_v25  ;;  %vm104_vm2 = vweird.f32 %v733_v28 }
 0x10c   :  { %734 = vrsqrt.f32 %v96_v29  ;;  %vm105_vm4 = vmor %vm103_vm3, %vm104_vm2  ;;  %vm113_vm6 = vweird.f32 %v96_v29 }
 0x10d   :  { %v99_v31 = vmul.f32 %v733_v28, %v98_v30  ;;  %v186_v30 = vld [vmem:[#allocation7 + $0x10] sm:$0xff] }
 0x10f   :  { %v100_v32 = vmul.f32 0.5, %v99_v31  ;;  %v188_v31 = vld [vmem:[#allocation7 + $0x20] sm:$0xff] }
 0x111   :  { %v101_v33 = vsub.f32 1.5, %v100_v32 }
 0x112   :  { %v735_v34 = vpop.eup %734 }
 0x113   :  { %v102_v35 = vmul.f32 %v733_v28, %v101_v33  ;;  %v108_v36 = vmul.f32 %v735_v34, %v96_v29  ;;  %vm114_vm5 = vweird.f32 %v735_v34 }
 0x114   :  { %vm115_vm7 = vmor %vm113_vm6, %vm114_vm5 }
 0x115   :  { %v109_v37 = vmul.f32 %v735_v34, %v108_v36  ;;  %v106_v38 = vsel %vm105_vm4, %v733_v28, %v102_v35 }
 0x116   :  { %v117_v41 = vmul.f32 %v106_v38, %v83_v13  ;;  %v189_v38 = vld [vmem:[#allocation7 + $0x28] sm:$0xff] }
 0x117   :  { %v110_v39 = vmul.f32 0.5, %v109_v37 }
 0x118   :  { %v120_v46 = vmul.f32 %v722_v42, %v117_v41 }
 0x119   :  { %v111_v40 = vsub.f32 1.5, %v110_v39 }
 0x11a   :  { %v123_v49 = vadd.f32 %v723_v47, %v120_v46  ;;  %v191_v46 = vld [vmem:[#allocation7 + $0x38] sm:$0xff] }
 0x11b   :  { %v112_v43 = vmul.f32 %v735_v34, %v111_v40 }
 0x11d   :  { %v116_v44 = vsel %vm115_vm7, %v735_v34, %v112_v43 }
 0x11e   :  { %v118_v45 = vmul.f32 %v116_v44, %v84_v18 }
 0x120   :  { %v121_v48 = vmul.f32 %v722_v42, %v118_v45  ;;  %v190_v42 = vld [vmem:[#allocation7 + $0x30] sm:$0xff] }
 0x122   :  { %v124_v50 = vadd.f32 %v723_v47, %v121_v48 }
 0x124   :  { %v125_v51 = vpack.c.bf16 %v124_v50, %v123_v49  ;;  %v192_v50 = vld [vmem:[#allocation7 + $0x40] sm:$0xff] }
 0x126   :  { %630 = vmatmul.msk.bf16.vlgmr.msra.gmra.mxu0 %vm67_vm0, %v125_v51 }
 0x1a3   :  { %v156_v52 = vpop.f32.mrf.mxu0 }
 0x1a4   :  { %v157_v55 = vadd.f32 %v724_v53, %v156_v52 }
 0x1ab   :  { %v158_v54 = vpop.f32.mrf.mxu0 }
 0x1ac   :  { %v159_v56 = vadd.f32 %v724_v53, %v158_v54 }
 0x1ae   :  { %v702_v57 = vpack.i.bf16 %v159_v56, %v157_v55  ;;  %v181_v58 = vpack.c.bf16 %v159_v56, %v157_v55 }
 0x1b0   :  { %703 = vrot.lane.b32.xlu0 %v702_v57, %s882_s2  ;;  %693 = vrot.lane.b32.xlu2 %v702_v57, %s883_s29 }
 0x1b8   :  { %698 = vrot.lane.b32.xlu2 %v702_v57, %s884_s30 }
 0x20a   :  { %v694_v59 = vpop.permute.xlu2 %693 }
 0x20b   :  { %v696_v60 = vunpack.i.h.bf16 %v694_v59  ;;  %v695_v61 = vunpack.i.l.bf16 %v694_v59 }
 0x20d   :  { %v184_v62 = vpack.c.bf16 %v696_v60, %v695_v61 }
 0x20f   :  { %350 = vrot.lane.b32.xlu0 %v184_v62, %s875_s20  ;;  %203 = vrot.lane.b32.xlu1 %v184_v62, %s885_s4 }
 0x212   :  { %v699_v63 = vpop.permute.xlu2 %698 }
 0x213   :  { %v701_v1 = vunpack.i.h.bf16 %v699_v63  ;;  %v700_v3 = vunpack.i.l.bf16 %v699_v63 }
 0x215   :  { %v183_v4 = vpack.c.bf16 %v701_v1, %v700_v3 }
 0x217   :  { %201 = vrot.lane.b32.xlu2 %v183_v4, %s885_s4  ;;  %348 = vrot.lane.b32.xlu0 %v183_v4, %s875_s20 }
 0x222   :  { %v704_v5 = vpop.permute.xlu0 %703 }
 0x223   :  { %v706_v6 = vunpack.i.h.bf16 %v704_v5  ;;  %v705_v7 = vunpack.i.l.bf16 %v704_v5 }
 0x225   :  { %v182_v8 = vpack.c.bf16 %v706_v6, %v705_v7 }
 0x227   :  { %199 = vrot.lane.b32.xlu2 %v182_v8, %s885_s4  ;;  %346 = vrot.lane.b32.xlu0 %v182_v8, %s875_s20 }
 0x22f   :  { %344 = vrot.lane.b32.xlu0 %v181_v58, %s875_s20  ;;  %197 = vrot.lane.b32.xlu2 %v181_v58, %s885_s4 }
 0x271   :  { %v202_v13 = vpop.permute.xlu2 %201 }
 0x272   :  { %v225_v15 = vsel %vm205_vm8, %v202_v13, 0 }
 0x281   :  { %v351_v9 = vpop.permute.xlu0 %350  ;;  %v204_v11 = vpop.permute.xlu1 %203 }
 0x282   :  { %372 = vmatpush.bf16.msra.mxu2 %v351_v9  ;;  %v228_v12 = vsel %vm205_vm8, %v204_v11, 0  ;;  %v200_v16 = vpop.permute.xlu2 %199 }
 0x283   :  { %234 = vmatpush.bf16.xpose.msrb.mxu0 %v228_v12  ;;  %673 = vmatpush.bf16.xpose.msra.mxu1 %v228_v12  ;;  %v222_v17 = vsel %vm205_vm8, %v200_v16, 0 }
 0x289   :  { %v349_v14 = vpop.permute.xlu0 %348 }
 0x28a   :  { %373 = vmatpush.bf16.msra.mxu2 %v349_v14  ;;  %v198_v18 = vpop.permute.xlu2 %197 }
 0x28b   :  { %235 = vmatpush.bf16.xpose.msrb.mxu0 %v225_v15  ;;  %674 = vmatpush.bf16.xpose.msra.mxu1 %v225_v15  ;;  %v219_v20 = vsel %vm205_vm8, %v198_v18, 0 }
 0x293   :  { %236 = vmatpush.bf16.xpose.msrb.mxu0 %v222_v17  ;;  %675 = vmatpush.bf16.xpose.msra.mxu1 %v222_v17 }
 0x299   :  { %v347_v19 = vpop.permute.xlu0 %346 }
 0x29a   :  { %374 = vmatpush.bf16.msra.mxu2 %v347_v19 }
 0x29b   :  { %237 = vmatpush.bf16.xpose.msrb.mxu0 %v219_v20  ;;  %676 = vmatpush.bf16.xpose.msra.mxu1 %v219_v20 }
 0x2a1   :  { %v345_v21 = vpop.permute.xlu0 %344 }
 0x2a2   :  { %375 = vmatpush.bf16.msra.mxu2 %v345_v21  ;;  %631 = vmatmul.msk.bf16.vlgmr.msrb.gmra.mxu0 %vm205_vm8, %v181_v58 }
 0x2a3   :  { %632 = vmatmul.msk.bf16.vlgmr.msra.gmra.mxu1 %vm205_vm8, %v182_v8 }
 0x2b3   :  { %633 = vmatmul.msk.bf16.gmra.mxu1 %vm205_vm8, %v183_v4 }
 0x2c3   :  { %634 = vmatmul.msk.bf16.gmra.mxu1 %vm205_vm8, %v184_v62 }
 0x31f   :  { %v239_v24 = vpop.f32.mrf.mxu0 }
 0x320   :  { %v244_v25 = vpop.f32.mrf.mxu1  ;;  %v240_v26 = vadd.f32 %v239_v24, %v185_v22 }
 0x321   :  { %v245_v27 = vadd.f32 %v244_v25, %v187_v23 }
 0x322   :  { %v260_v29 = vsel %vm259_vm9, %v240_v26, -inf }
 0x323   :  { %v266_v28 = vsel %vm259_vm9, %v245_v27, -inf  ;;  %261 = vmax.xlane.f32.xlu2 %v260_v29 }
 0x324   :  { %267 = vmax.xlane.f32.xlu0 %v266_v28 }
 0x327   :  { %v241_v32 = vpop.f32.mrf.mxu0 }
 0x328   :  { %v246_v33 = vpop.f32.mrf.mxu1  ;;  %v242_v34 = vadd.f32 %v241_v32, %v186_v30 }
 0x329   :  { %v247_v35 = vadd.f32 %v246_v33, %v188_v31 }
 0x32a   :  { %v263_v36 = vsel %vm259_vm9, %v242_v34, -inf }
 0x32b   :  { %v269_v37 = vsel %vm259_vm9, %v247_v35, -inf  ;;  %264 = vmax.xlane.f32.xlu1 %v263_v36 }
 0x32c   :  { %270 = vmax.xlane.f32.xlu2 %v269_v37 }
 0x330   :  { %v249_v39 = vpop.f32.mrf.mxu1 }
 0x331   :  { %v250_v40 = vadd.f32 %v249_v39, %v189_v38 }
 0x333   :  { %v272_v41 = vsel %vm259_vm9, %v250_v40, -inf }
 0x334   :  { %273 = vmax.xlane.f32.xlu1 %v272_v41 }
 0x338   :  { %v251_v43 = vpop.f32.mrf.mxu1 }
 0x339   :  { %v252_v44 = vadd.f32 %v251_v43, %v190_v42 }
 0x33b   :  { %v275_v45 = vsel %vm259_vm9, %v252_v44, -inf }
 0x33c   :  { %276 = vmax.xlane.f32.xlu2 %v275_v45 }
 0x340   :  { %v254_v47 = vpop.f32.mrf.mxu1 }
 0x341   :  { %v255_v48 = vadd.f32 %v254_v47, %v191_v46 }
 0x343   :  { %v278_v49 = vsel %vm259_vm9, %v255_v48, -inf }
 0x344   :  { %279 = vmax.xlane.f32.xlu1 %v278_v49 }
 0x348   :  { %v256_v51 = vpop.f32.mrf.mxu1 }
 0x349   :  { %v257_v52 = vadd.f32 %v256_v51, %v192_v50 }
 0x34b   :  { %v281_v53 = vsel %vm259_vm9, %v257_v52, -inf }
 0x34c   :  { %282 = vmax.xlane.f32.xlu2 %v281_v53 }
 0x396   :  { %v262_v55 = vpop.xlane.xlu2 %261 }
 0x397   :  { %v268_v54 = vpop.xlane.xlu0 %267  ;;  %v284_v58 = vsub.f32 %v240_v26, %v262_v55 }
 0x398   :  { %v286_v56 = vsub.f32 %v245_v27, %v268_v54 }
 0x399   :  { %v292_v59 = vmul.f32 1.442695, %v284_v58 }
 0x39a   :  { %v296_v57 = vmul.f32 1.442695, %v286_v56 }
 0x39c   :  { %736 = vpow2.f32 %v296_v57 }
 0x39d   :  { %738 = vpow2.f32 %v292_v59 }
 0x39e   :  { %v265_v60 = vpop.xlane.xlu1 %264 }
 0x39f   :  { %v271_v61 = vpop.xlane.xlu2 %270  ;;  %v285_v62 = vsub.f32 %v242_v34, %v265_v60 }
 0x3a0   :  { %v287_v63 = vsub.f32 %v247_v35, %v271_v61 }
 0x3a1   :  { %v294_v3 = vmul.f32 1.442695, %v285_v62 }
 0x3a2   :  { %v737_v1 = vpop.eup %736  ;;  %v298_v4 = vmul.f32 1.442695, %v287_v63 }
 0x3a3   :  { %v314_v5 = vsel %vm259_vm9, %v737_v1, 0.0  ;;  %740 = vpow2.f32 %v294_v3  ;;  %v739_v8 = vpop.eup %738 }
 0x3a4   :  { %315 = vadd.xlane.f32.xlu1 %v314_v5  ;;  %742 = vpow2.f32 %v298_v4  ;;  %v308_v31 = vsel %vm259_vm9, %v739_v8, 0.0  ;;  %v668_v4 = vld [vmem:[#allocation5 + $0x18] sm:$0xff]  ;;  %v667_v5 = vld [vmem:[#allocation5 + $0x10] sm:$0xff] }
 0x3a5   :  { %465 = vmatpush.bf16.msra.mxu3 %v668_v4 }
 0x3a7   :  { %v274_v6 = vpop.xlane.xlu1 %273 }
 0x3a8   :  { %v288_v7 = vsub.f32 %v250_v40, %v274_v6 }
 0x3a9   :  { %v741_v9 = vpop.eup %740  ;;  %466 = vmatpush.bf16.msra.mxu3 %v667_v5 }
 0x3aa   :  { %v300_v11 = vmul.f32 1.442695, %v288_v7  ;;  %v743_v12 = vpop.eup %742  ;;  %v340_v13 = vpack.c.bf16 %v741_v9, %v739_v8  ;;  %v311_v33 = vsel %vm259_vm9, %v741_v9, 0.0 }
 0x3ab   :  { %v317_v14 = vsel %vm259_vm9, %v743_v12, 0.0  ;;  %v341_v25 = vpack.c.bf16 %v743_v12, %v737_v1 }
 0x3ac   :  { %744 = vpow2.f32 %v300_v11  ;;  %318 = vadd.xlane.f32.xlu2 %v317_v14  ;;  %635 = vmatmul.msk.bf16.vlgmr.msra.gmra.mxu2 %vm259_vm9, %v340_v13 }
 0x3af   :  { %v277_v15 = vpop.xlane.xlu2 %276 }
 0x3b0   :  { %v289_v16 = vsub.f32 %v252_v44, %v277_v15 }
 0x3b2   :  { %v745_v17 = vpop.eup %744  ;;  %v302_v18 = vmul.f32 1.442695, %v289_v16 }
 0x3b3   :  { %v320_v19 = vsel %vm259_vm9, %v745_v17, 0.0 }
 0x3b4   :  { %746 = vpow2.f32 %v302_v18  ;;  %321 = vadd.xlane.f32.xlu1 %v320_v19 }
 0x3b7   :  { %v280_v20 = vpop.xlane.xlu1 %279 }
 0x3b8   :  { %v290_v21 = vsub.f32 %v255_v48, %v280_v20 }
 0x3ba   :  { %v747_v22 = vpop.eup %746  ;;  %v304_v23 = vmul.f32 1.442695, %v290_v21 }
 0x3bb   :  { %v323_v24 = vsel %vm259_vm9, %v747_v22, 0.0  ;;  %v342_v35 = vpack.c.bf16 %v747_v22, %v745_v17 }
 0x3bc   :  { %748 = vpow2.f32 %v304_v23  ;;  %324 = vadd.xlane.f32.xlu0 %v323_v24  ;;  %636 = vmatmul.msk.bf16.gmra.mxu2 %vm259_vm9, %v341_v25 }
 0x3bf   :  { %v283_v26 = vpop.xlane.xlu2 %282 }
 0x3c0   :  { %v291_v27 = vsub.f32 %v257_v52, %v283_v26 }
 0x3c2   :  { %v749_v28 = vpop.eup %748  ;;  %v306_v29 = vmul.f32 1.442695, %v291_v27 }
 0x3c3   :  { %v326_v30 = vsel %vm259_vm9, %v749_v28, 0.0 }
 0x3c4   :  { %750 = vpow2.f32 %v306_v29  ;;  %327 = vadd.xlane.f32.xlu2 %v326_v30  ;;  %309 = vadd.xlane.f32.xlu0 %v308_v31  ;;  %v725_v29 = vld [vmem:[#allocation7 + $0x5] ss:$0 sm:$0xff] }
 0x3ca   :  { %v751_v32 = vpop.eup %750 }
 0x3cb   :  { %v329_v34 = vsel %vm259_vm9, %v751_v32, 0.0  ;;  %v343_v36 = vpack.c.bf16 %v751_v32, %v749_v28 }
 0x3cc   :  { %312 = vadd.xlane.f32.xlu2 %v311_v33  ;;  %330 = vadd.xlane.f32.xlu1 %v329_v34 }
 0x3cd   :  { %637 = vmatmul.msk.bf16.gmra.mxu2 %vm259_vm9, %v342_v35 }
 0x3dd   :  { %638 = vmatmul.msk.bf16.gmra.mxu2 %vm259_vm9, %v343_v36 }
 0x417   :  { %v316_v39 = vpop.xlane.xlu1 %315 }
 0x418   :  { %752 = vrcp.f32 %v316_v39 }
 0x41e   :  { %v753_v42 = vpop.eup %752 }
 0x41f   :  { %v319_v40 = vpop.xlane.xlu2 %318 }
 0x420   :  { %754 = vrcp.f32 %v319_v40 }
 0x426   :  { %v755_v43 = vpop.eup %754 }
 0x427   :  { %v322_v48 = vpop.xlane.xlu1 %321 }
 0x428   :  { %756 = vrcp.f32 %v322_v48 }
 0x42e   :  { %v757_v51 = vpop.eup %756 }
 0x42f   :  { %v377_v37 = vpop.f32.mrf.mxu2  ;;  %v325_v49 = vpop.xlane.xlu0 %324 }
 0x430   :  { %758 = vrcp.f32 %v325_v49 }
 0x436   :  { %v759_v52 = vpop.eup %758 }
 0x437   :  { %v379_v38 = vpop.f32.mrf.mxu2  ;;  %v328_v57 = vpop.xlane.xlu2 %327 }
 0x438   :  { %760 = vrcp.f32 %v328_v57  ;;  %v310_v6 = vpop.xlane.xlu0 %309 }
 0x43e   :  { %v761_v60 = vpop.eup %760 }
 0x43f   :  { %v382_v41 = vpop.f32.mrf.mxu2  ;;  %v331_v58 = vpop.xlane.xlu1 %330 }
 0x440   :  { %v399_v45 = vmul.f32 %v753_v42, %v382_v41  ;;  %762 = vrcp.f32 %v331_v58  ;;  %v313_v7 = vpop.xlane.xlu2 %312 }
 0x441   :  { %764 = vrcp.f32 %v310_v6 }
 0x442   :  { %766 = vrcp.f32 %v313_v7 }
 0x446   :  { %v763_v61 = vpop.eup %762 }
 0x447   :  { %v384_v44 = vpop.f32.mrf.mxu2  ;;  %v765_v9 = vpop.eup %764 }
 0x448   :  { %v400_v46 = vmul.f32 %v755_v43, %v384_v44  ;;  %v767_v11 = vpop.eup %766  ;;  %v397_v15 = vmul.f32 %v765_v9, %v377_v37 }
 0x449   :  { %v398_v16 = vmul.f32 %v767_v11, %v379_v38 }
 0x44a   :  { %v707_v47 = vpack.i.bf16 %v400_v46, %v399_v45  ;;  %v670_v46 = vld [vmem:[#allocation5 + $0x28] sm:$0xff] }
 0x44b   :  { %555 = vmatpush.bf16.msra.mxu0 %v670_v46 }
 0x44c   :  { %708 = vrot.lane.b32.xlu1 %v707_v47, %s879_s1 }
 0x450   :  { %v387_v50 = vpop.f32.mrf.mxu2 }
 0x451   :  { %v401_v54 = vmul.f32 %v757_v51, %v387_v50  ;;  %v669_v50 = vld [vmem:[#allocation5 + $0x20] sm:$0xff]  ;;  %v672_v51 = vld [vmem:[#allocation5 + $0x38] sm:$0xff] }
 0x452   :  { %556 = vmatpush.bf16.msra.mxu0 %v669_v50  ;;  %590 = vmatpush.bf16.xpose.msrb.mxu3 %v672_v51 }
 0x458   :  { %v389_v53 = vpop.f32.mrf.mxu2 }
 0x459   :  { %v402_v55 = vmul.f32 %v759_v52, %v389_v53 }
 0x45b   :  { %v712_v56 = vpack.i.bf16 %v402_v55, %v401_v54 }
 0x45d   :  { %713 = vrot.lane.b32.xlu0 %v712_v56, %s886_s5 }
 0x460   :  { %v392_v59 = vpop.f32.mrf.mxu2 }
 0x461   :  { %v403_v63 = vmul.f32 %v761_v60, %v392_v59 }
 0x468   :  { %v394_v62 = vpop.f32.mrf.mxu2 }
 0x469   :  { %v404_v1 = vmul.f32 %v763_v61, %v394_v62 }
 0x46b   :  { %v717_v3 = vpack.i.bf16 %v404_v1, %v403_v63 }
 0x46d   :  { %718 = vrot.lane.b32.xlu2 %v717_v3, %s887_s6 }
 0x4be   :  { %v709_v8 = vpop.permute.xlu1 %708 }
 0x4bf   :  { %v711_v12 = vunpack.i.h.bf16 %v709_v8  ;;  %v710_v13 = vunpack.i.l.bf16 %v709_v8  ;;  %v727_v8 = vld [vmem:[#allocation7 + $0x3] ss:$0 sm:$0xff] }
 0x4c1   :  { %v429_v20 = vsel %vm205_vm8, %v397_v15, %v710_v13  ;;  %v430_v21 = vsel %vm205_vm8, %v398_v16, %v711_v12  ;;  %v671_v16 = vld [vmem:[#allocation5 + $0x30] sm:$0xff] }
 0x4c2   :  { %591 = vmatpush.bf16.xpose.msrb.mxu3 %v671_v16 }
 0x4c7   :  { %v719_v14 = vpop.permute.xlu2 %718 }
 0x4c8   :  { %v721_v22 = vunpack.i.h.bf16 %v719_v14  ;;  %v720_v23 = vunpack.i.l.bf16 %v719_v14 }
 0x4cf   :  { %v714_v17 = vpop.permute.xlu0 %713 }
 0x4d0   :  { %v716_v18 = vunpack.i.h.bf16 %v714_v17  ;;  %v715_v19 = vunpack.i.l.bf16 %v714_v17 }
 0x4d2   :  { %v432_v24 = vsel %vm431_vm10, %v429_v20, %v715_v19  ;;  %v433_v25 = vsel %vm431_vm10, %v430_v21, %v716_v18  ;;  %v728_v18 = vld [vmem:[#allocation7 + $0x6] ss:$0 sm:$0xff] }
 0x4d3   :  { %v435_v26 = vsel %vm434_vm11, %v432_v24, %v720_v23  ;;  %v436_v27 = vsel %vm434_vm11, %v433_v25, %v721_v22  ;;  %v729_v25 = vld [vmem:[#allocation7 + $0x7] ss:$0 sm:$0xff] }
 0x4d4   :  { %v437_v28 = vpack.c.bf16 %v436_v27, %v435_v26 }
 0x4d6   :  { %647 = vmatmul.msk.bf16.vlgmr.msra.gmra.mxu3 %vm67_vm0, %v437_v28 }
 0x559   :  { %v468_v30 = vpop.f32.mrf.mxu3 }
 0x55a   :  { %v469_v31 = vadd.f32 %v725_v29, %v468_v30 }
 0x55c   :  { %v982_v32 = vadd.f32 %v469_v31, %v926_v0 }
 0x55e   :  { %v477_v33 = vsel %vm67_vm0, %v982_v32, 0.0 }
 0x55f   :  { %478 = vadd.xlane.f32.xlu0 %v477_v33 }
 0x561   :  { %v470_v34 = vpop.f32.mrf.mxu3 }
 0x562   :  { %v471_v35 = vadd.f32 %v725_v29, %v470_v34 }
 0x564   :  { %v987_v36 = vadd.f32 %v471_v35, %v930_v2 }
 0x566   :  { %v480_v37 = vsel %vm67_vm0, %v987_v36, 0.0 }
 0x567   :  { %481 = vadd.xlane.f32.xlu1 %v480_v37 }
 0x5d2   :  { %v479_v38 = vpop.xlane.xlu0 %478 }
 0x5d3   :  { %v483_v39 = vmul.f32 %v479_v38, %v934_v10 }
 0x5d5   :  { %v485_v40 = vsub.f32 %v982_v32, %v483_v39 }
 0x5d7   :  { %v487_v0 = vmul.f32 %v485_v40, %v485_v40 }
 0x5d9   :  { %v489_v41 = vsel %vm67_vm0, %v487_v0, 0.0 }
 0x5da   :  { %v482_v42 = vpop.xlane.xlu1 %481  ;;  %490 = vadd.xlane.f32.xlu2 %v489_v41 }
 0x5db   :  { %v484_v43 = vmul.f32 %v482_v42, %v934_v10 }
 0x5dd   :  { %v486_v44 = vsub.f32 %v987_v36, %v484_v43 }
 0x5df   :  { %v488_v2 = vmul.f32 %v486_v44, %v486_v44 }
 0x5e1   :  { %v492_v45 = vsel %vm67_vm0, %v488_v2, 0.0 }
 0x5e2   :  { %493 = vadd.xlane.f32.xlu0 %v492_v45 }
 0x64d   :  { %v491_v47 = vpop.xlane.xlu2 %490 }
 0x64e   :  { %v495_v48 = vmul.f32 %v491_v47, %v934_v10 }
 0x650   :  { %v497_v49 = vadd.f32 1e-05, %v495_v48 }
 0x652   :  { %768 = vrsqrt.f32 %v497_v49  ;;  %vm505_vm13 = vweird.f32 %v497_v49 }
 0x655   :  { %v494_v52 = vpop.xlane.xlu0 %493 }
 0x656   :  { %v496_v53 = vmul.f32 %v494_v52, %v934_v10  ;;  %v726_v10 = vld [vmem:[#allocation7 + $0x2] ss:$0 sm:$0xff] }
 0x658   :  { %v769_v54 = vpop.eup %768  ;;  %v498_v55 = vadd.f32 1e-05, %v496_v53 }
 0x659   :  { %v500_v56 = vmul.f32 %v769_v54, %v497_v49  ;;  %vm506_vm12 = vweird.f32 %v769_v54 }
 0x65a   :  { %770 = vrsqrt.f32 %v498_v55  ;;  %vm507_vm14 = vmor %vm505_vm13, %vm506_vm12  ;;  %vm515_vm1 = vweird.f32 %v498_v55 }
 0x65b   :  { %v501_v57 = vmul.f32 %v769_v54, %v500_v56 }
 0x65d   :  { %v502_v58 = vmul.f32 0.5, %v501_v57 }
 0x65f   :  { %v503_v59 = vsub.f32 1.5, %v502_v58 }
 0x660   :  { %v771_v60 = vpop.eup %770 }
 0x661   :  { %v504_v61 = vmul.f32 %v769_v54, %v503_v59  ;;  %v510_v62 = vmul.f32 %v771_v60, %v498_v55  ;;  %vm516_vm15 = vweird.f32 %v771_v60 }
 0x662   :  { %vm517_vm2 = vmor %vm515_vm1, %vm516_vm15 }
 0x663   :  { %v511_v63 = vmul.f32 %v771_v60, %v510_v62  ;;  %v508_v1 = vsel %vm507_vm14, %v769_v54, %v504_v61 }
 0x664   :  { %v519_v5 = vmul.f32 %v508_v1, %v485_v40 }
 0x665   :  { %v512_v3 = vmul.f32 0.5, %v511_v63 }
 0x666   :  { %v522_v9 = vmul.f32 %v726_v10, %v519_v5 }
 0x667   :  { %v513_v4 = vsub.f32 1.5, %v512_v3 }
 0x668   :  { %v525_v13 = vadd.f32 %v727_v8, %v522_v9 }
 0x669   :  { %v514_v6 = vmul.f32 %v771_v60, %v513_v4 }
 0x66b   :  { %v518_v7 = vsel %vm517_vm2, %v771_v60, %v514_v6 }
 0x66c   :  { %v520_v11 = vmul.f32 %v518_v7, %v486_v44 }
 0x66e   :  { %v523_v12 = vmul.f32 %v726_v10, %v520_v11 }
 0x670   :  { %v526_v14 = vadd.f32 %v727_v8, %v523_v12 }
 0x672   :  { %v527_v15 = vpack.c.bf16 %v526_v14, %v525_v13 }
 0x674   :  { %656 = vmatmul.msk.bf16.vlgmr.msra.gmra.mxu0 %vm67_vm0, %v527_v15 }
 0x6f1   :  { %v558_v17 = vpop.f32.mrf.mxu0 }
 0x6f2   :  { %v559_v19 = vadd.f32 %v728_v18, %v558_v17 }
 0x6f4   :  { %v563_v22 = vmax.f32 %v559_v19, 0.0 }
 0x6f9   :  { %v560_v20 = vpop.f32.mrf.mxu0 }
 0x6fa   :  { %v561_v21 = vadd.f32 %v728_v18, %v560_v20 }
 0x6fc   :  { %v564_v23 = vmax.f32 %v561_v21, 0.0 }
 0x6fe   :  { %v565_v24 = vpack.c.bf16 %v564_v23, %v563_v22 }
 0x700   :  { %592 = vmatmul.bf16.vlgmr.msrb.gmra.mxu3 %v565_v24 }
 0x783   :  { %v593_v26 = vpop.f32.mrf.mxu3 }
 0x784   :  { %v594_v27 = vadd.f32 %v729_v25, %v593_v26 }
 0x786   :  { %v598_v28 = vadd.f32 %v594_v27, %v982_v32 }
 0x788   :  { %600 = vst.msk [vmem:[#allocation8] sm:$0xff] %vm67_vm0, %v598_v28 }
 0x78b   :  { %v595_v29 = vpop.f32.mrf.mxu3 }
 0x78c   :  { %v596_v30 = vadd.f32 %v729_v25, %v595_v29 }
 0x78e   :  { %v599_v31 = vadd.f32 %v596_v30, %v987_v36 }
 0x790   :  { %601 = vst.msk [vmem:[#allocation8 + $0x8] sm:$0xff] %vm67_vm0, %v599_v31 }
 0x791   :  { %614 = dma.vmem_to_hbm [thread:$0]  %s607_s8, 256, %s609_s11, [#allocation4], %s878_s24, %s878_s24, %s879_s1  }
 0x792   :  { %872 = dma.done.wait [#allocation4], 256  }
 0x793   :  { %873 = vsyncadd [#allocation4], 4294967040 }
 0x794   :  { %619 = vsyncpa [#allocation3], 1 }
 0x795   :  { %620 = vsyncpa [#allocation6], 1 }
 0x796   :  { %621 = vsyncpa [#allocation4], 1 }

</bundles_post_ra>
